<compile_context>
chip_gen: v7x
topology: tpu7x:2x2x1
jax: 0.10.0
libtpu: 0.0.40
codegen_flags: <defaults>
</compile_context>

<pallas_src>
import jax
import jax.numpy as jnp
from jax.experimental import pallas as pl
from jax.experimental.pallas import tpu as pltpu


def _mlp_kernel(xT_ref, w1_ref, b1_ref, w2_ref, b2_ref, o_ref):
    # xT: [4, bt]   w1: [16, 4]   b1: [16, 1]   w2: [3, 16]   b2: [3, 1]
    # fc1 + ReLU:  [16, 4] @ [4, bt] -> [16, bt]
    h = jnp.dot(w1_ref[...], xT_ref[...], preferred_element_type=jnp.float32)
    h = jnp.maximum(h + b1_ref[...], 0.0)
    # fc2: [3, 16] @ [16, bt] -> [3, bt]   (f32 flows straight through)
    y = jnp.dot(w2_ref[...], h, preferred_element_type=jnp.float32)
    o_ref[...] = (y + b2_ref[...]).astype(o_ref.dtype)


def _choose_bt(B, block_b):
    """Pick the batch tile (lane dimension of each block).

    - multiple of 128 (hard layout requirement for the BlockSpec last dim)
    - capped so large batches get an even, >=2-step grid, so the "parallel"
      grid axis can be split across the 2 TensorCores of a v7x chip.
    """
    bb = max(128, (int(block_b) // 128) * 128)
    half = 128 * pl.cdiv(pl.cdiv(B, 128), 2)
    return min(bb, half)


def mlp_forward_t(xT, w1, b1, w2, b2, *, block_b=65536):
    """Preferred entry point: batch-on-lanes layout, zero wrapper traffic.

    xT : [4, B]  float32   (features, batch)
    w1 : [16, 4], b1: [16]   (PyTorch nn.Linear layout [out, in])
    w2 : [3, 16], b2: [3]
    returns [3, B]
    """
    f_in, B = xT.shape
    f_hid = w1.shape[0]
    f_out = w2.shape[0]

    bt = _choose_bt(B, block_b)
    grid = (pl.cdiv(B, bt),)

    b1_col = b1.reshape(f_hid, 1)
    b2_col = b2.reshape(f_out, 1)

    return pl.pallas_call(
        _mlp_kernel,
        out_shape=jax.ShapeDtypeStruct((f_out, B), xT.dtype),
        grid=grid,
        in_specs=[
            pl.BlockSpec((f_in, bt), lambda i: (0, i)),      # xT tile (pipelined)
            pl.BlockSpec((f_hid, f_in), lambda i: (0, 0)),   # w1 resident
            pl.BlockSpec((f_hid, 1), lambda i: (0, 0)),      # b1 resident
            pl.BlockSpec((f_out, f_hid), lambda i: (0, 0)),  # w2 resident
            pl.BlockSpec((f_out, 1), lambda i: (0, 0)),      # b2 resident
        ],
        out_specs=pl.BlockSpec((f_out, bt), lambda i: (0, i)),  # lane-dense out
        compiler_params=pltpu.CompilerParams(
            dimension_semantics=("parallel",)),
    )(xT, w1, b1_col, w2, b2_col)


def mlp_forward(x, w1, b1, w2, b2, *, block_b=65536):
    """PyTorch-convention wrapper (drop-in semantics of NeuralNetwork.forward).

    x: [B, 4] -> [B, 3].  Adds one transpose each way (no padded copy); for
    best end-to-end throughput, produce/consume [features, batch] and call
    `mlp_forward_t` directly.
    """
    yT = mlp_forward_t(x.T, w1, b1, w2, b2, block_b=block_b)
    return yT.T


def init_params(key):
    """Deterministic init mimicking nn.Linear default (uniform +/- 1/sqrt(fan_in)).

    Weights use the PyTorch layout: [out_features, in_features]."""
    k1, k2, k3, k4 = jax.random.split(key, 4)
    in1, out1 = 4, 16
    in2, out2 = 16, 3
    bound1 = 1.0 / jnp.sqrt(in1)
    bound2 = 1.0 / jnp.sqrt(in2)
    w1 = jax.random.uniform(k1, (out1, in1), jnp.float32, -bound1, bound1)
    b1 = jax.random.uniform(k2, (out1,), jnp.float32, -bound1, bound1)
    w2 = jax.random.uniform(k3, (out2, in2), jnp.float32, -bound2, bound2)
    b2 = jax.random.uniform(k4, (out2,), jnp.float32, -bound2, bound2)
    return w1, b1, w2, b2


def _ref_forward(x, w1, b1, w2, b2):
    return jnp.maximum(x @ w1.T + b1, 0.0) @ w2.T + b2


# TODO(synk): the training / loss-surface / plotting methods of the PyTorch
# module (Adam, CrossEntropyLoss, matplotlib) are not part of the forward pass
# and are not implemented here.

if __name__ == "__main__":
    key = jax.random.PRNGKey(0)
    kx, kxt, kp = jax.random.split(key, 3)
    w1, b1, w2, b2 = init_params(kp)

    # 1) PyTorch-convention entry point, small batch (single grid step).
    B = 8
    x = jax.random.normal(kx, (B, 4), jnp.float32)
    out = jax.block_until_ready(mlp_forward(x, w1, b1, w2, b2))
    ref = _ref_forward(x, w1, b1, w2, b2)
    assert out.shape == (B, 3)
    assert jnp.allclose(out, ref, atol=1e-4, rtol=1e-4)

    # 2) Preferred [features, batch] entry point with a ragged batch forcing a
    #    multi-step grid and a partial last block (no padded copy anywhere).
    B2 = 300
    xT2 = jax.random.normal(kxt, (4, B2), jnp.float32)
    out2 = jax.block_until_ready(
        mlp_forward_t(xT2, w1, b1, w2, b2, block_b=128))
    ref2 = _ref_forward(xT2.T, w1, b1, w2, b2).T
    assert out2.shape == (3, B2)
    assert jnp.allclose(out2, ref2, atol=1e-4, rtol=1e-4)

    print("KERNEL_OK")
</pallas_src>

<mosaic_0001>
module attributes {stable_mosaic.version = 11 : i64} {
  func.func @_mlp_kernel(%arg0: i32, %arg1: memref<4x128xf32, #tpu.memory_space<vmem>>, %arg2: memref<16x4xf32, #tpu.memory_space<vmem>>, %arg3: memref<16x1xf32, #tpu.memory_space<vmem>>, %arg4: memref<3x16xf32, #tpu.memory_space<vmem>>, %arg5: memref<3x1xf32, #tpu.memory_space<vmem>>, %arg6: memref<3x128xf32, #tpu.memory_space<vmem>>) attributes {dimension_semantics = [#tpu.dimension_semantics<parallel>], iteration_bounds = array<i64: 1>, scalar_prefetch = 0 : i64, scratch_operands = 0 : i64, tpu.core_type = #tpu.core_type<tc>, window_params = [{transform_indices = @transform_0, window_bounds = array<i64: 4, 128>}, {pipeline_mode = #tpu.pipeline_mode<synchronous>, transform_indices = @transform_1, window_bounds = array<i64: 16, 4>}, {pipeline_mode = #tpu.pipeline_mode<synchronous>, transform_indices = @transform_2, window_bounds = array<i64: 16, 1>}, {pipeline_mode = #tpu.pipeline_mode<synchronous>, transform_indices = @transform_3, window_bounds = array<i64: 3, 16>}, {pipeline_mode = #tpu.pipeline_mode<synchronous>, transform_indices = @transform_4, window_bounds = array<i64: 3, 1>}, {transform_indices = @transform_5, window_bounds = array<i64: 3, 128>}]} {
    %c0 = arith.constant 0 : index
    %c0_0 = arith.constant 0 : index
    %0 = vector.load %arg2[%c0, %c0_0] : memref<16x4xf32, #tpu.memory_space<vmem>>, vector<16x4xf32>
    %c0_1 = arith.constant 0 : index
    %c0_2 = arith.constant 0 : index
    %1 = vector.load %arg1[%c0_1, %c0_2] : memref<4x128xf32, #tpu.memory_space<vmem>>, vector<4x128xf32>
    %cst = arith.constant dense<0.000000e+00> : vector<16x128xf32>
    %2 = tpu.matmul %0, %1, %cst {dimension_numbers = #tpu.dot_dimension_numbers<[1], [0], [0], [1], [0, 0, 1, 1], [], []>} : vector<16x4xf32>, vector<4x128xf32>, vector<16x128xf32> -> vector<16x128xf32>
    %c0_3 = arith.constant 0 : index
    %c0_4 = arith.constant 0 : index
    %3 = vector.load %arg3[%c0_3, %c0_4] : memref<16x1xf32, #tpu.memory_space<vmem>>, vector<16x1xf32>
    %4 = vector.broadcast %3 : vector<16x1xf32> to vector<16x128xf32>
    %5 = arith.addf %2, %4 : vector<16x128xf32>
    %cst_5 = arith.constant 0.000000e+00 : f32
    %6 = vector.broadcast %cst_5 : f32 to vector<16x128xf32>
    %7 = arith.maximumf %5, %6 : vector<16x128xf32>
    %c0_6 = arith.constant 0 : index
    %c0_7 = arith.constant 0 : index
    %8 = vector.load %arg4[%c0_6, %c0_7] : memref<3x16xf32, #tpu.memory_space<vmem>>, vector<3x16xf32>
    %cst_8 = arith.constant dense<0.000000e+00> : vector<3x128xf32>
    %9 = tpu.matmul %8, %7, %cst_8 {dimension_numbers = #tpu.dot_dimension_numbers<[1], [0], [0], [1], [0, 0, 1, 1], [], []>} : vector<3x16xf32>, vector<16x128xf32>, vector<3x128xf32> -> vector<3x128xf32>
    %c0_9 = arith.constant 0 : index
    %c0_10 = arith.constant 0 : index
    %10 = vector.load %arg5[%c0_9, %c0_10] : memref<3x1xf32, #tpu.memory_space<vmem>>, vector<3x1xf32>
    %11 = vector.broadcast %10 : vector<3x1xf32> to vector<3x128xf32>
    %12 = arith.addf %9, %11 : vector<3x128xf32>
    %c0_11 = arith.constant 0 : index
    %c0_12 = arith.constant 0 : index
    %13 = vector.load %arg6[%c0_11, %c0_12] : memref<3x128xf32, #tpu.memory_space<vmem>>, vector<3x128xf32>
    tpu.vector_store %arg6[%c0_11, %c0_12], %12 {strides = array<i32>} : memref<3x128xf32, #tpu.memory_space<vmem>>, vector<3x128xf32>,
    return
  }
  func.func @transform_0(%arg0: i32) -> (i32, i32) {
    %c0_i32 = arith.constant 0 : i32
    %c0_i32_0 = arith.constant 0 : i32
    return %c0_i32, %arg0 : i32, i32
  }
  func.func @transform_1(%arg0: i32) -> (i32, i32) {
    %c0_i32 = arith.constant 0 : i32
    %c0_i32_0 = arith.constant 0 : i32
    %c0_i32_1 = arith.constant 0 : i32
    return %c0_i32, %c0_i32_0 : i32, i32
  }
  func.func @transform_2(%arg0: i32) -> (i32, i32) {
    %c0_i32 = arith.constant 0 : i32
    %c0_i32_0 = arith.constant 0 : i32
    %c0_i32_1 = arith.constant 0 : i32
    return %c0_i32, %c0_i32_0 : i32, i32
  }
  func.func @transform_3(%arg0: i32) -> (i32, i32) {
    %c0_i32 = arith.constant 0 : i32
    %c0_i32_0 = arith.constant 0 : i32
    %c0_i32_1 = arith.constant 0 : i32
    return %c0_i32, %c0_i32_0 : i32, i32
  }
  func.func @transform_4(%arg0: i32) -> (i32, i32) {
    %c0_i32 = arith.constant 0 : i32
    %c0_i32_0 = arith.constant 0 : i32
    %c0_i32_1 = arith.constant 0 : i32
    return %c0_i32, %c0_i32_0 : i32, i32
  }
  func.func @transform_5(%arg0: i32) -> (i32, i32) {
    %c0_i32 = arith.constant 0 : i32
    %c0_i32_0 = arith.constant 0 : i32
    return %c0_i32, %arg0 : i32, i32
  }
}

</mosaic_0001>

<bundles_post_ra>
// kernel: tpu_custom_call.1
= control target key start
LH: loop header
LB: loop body
LE: loop exit
PB: predicated region body
PF: predicated region fallthrough
CT: control target
= control target key end

     0   :  { %vm43_vm0 = vcmask 1043456   ;;  %vm36_vm1 = vcmask 31744   ;;  %s344_s0 = inlined_call_operand.vmem [shape: f32[4,8], index: 0, kind: input, shape index: {}]   ;;  %s345_s1 = inlined_call_operand.vmem [shape: f32[16,4], index: 1, kind: input, shape index: {}]   ;;  %s346_s2 = inlined_call_operand.vmem [shape: f32[16,1], index: 2, kind: input, shape index: {}]   ;;  %s347_s3 = inlined_call_operand.vmem [shape: f32[3,16], index: 3, kind: input, shape index: {}]   ;;  %s348_s4 = inlined_call_operand.vmem [shape: f32[3,1], index: 4, kind: input, shape index: {}]   ;;  %s349_s5 = inlined_call_operand.hbm [shape: f32[3,8], index: 5, kind: output, shape index: {}]  }
   0x1   :  { %v23_v0 = vld [vmem:[%s344_s0] sm:$0xf]  ;;  %v22_v2 = vld [vmem:[%s345_s1 + $0x8] sm:$0xff] }
   0x2   :  { %v21_v1 = vld [vmem:[%s345_s1] sm:$0xff]  ;;  %230 = vmatprep.subr.msk.mxu0 %vm43_vm0, %v23_v0 }
   0x3   :  { %232 = vmatprep.mubr.msk.f32.mxu0 %vm36_vm1, %v21_v1  ;;  %v24_v3 = vld [vmem:[%s346_s2] sm:$0xff] }
   0x4   :  { %10 = vsyncpa [#allocation3], 0  ;;  %231 = vmatpush3.msk.msra.mxu0 %vm43_vm0, %v23_v0  ;;  %v276_v4 = vmov 0   ;;  %v25_v5 = vld [vmem:[%s346_s2 + $0x8] sm:$0xff]  ;;  %v277_v6 = vmov 0.0|0.0   ;;  %vm278_vm2 = vmmov 0  }
   0x5   :  { %250 = vset.pattern.permute.xlu0 %v276_v4  ;;  %233 = vmatmul.mubr.msk.f32.vlgmr.msra.gmra.mrb[0].mxu0 %vm36_vm1, %v22_v2  ;;  %v279_v7 = vmov 0.0   ;;  %v125_v8 = vld [vmem:[%s348_s4] sm:$0x7]  ;;  %vm131_vm3 = vcmask 130048   ;;  %s280_s29 = smov [#allocation2]  }
   0x6   :  { %28 = vperm.xlu0 %250, %v24_v3   ;;  %251 = vset.pattern.permute.xlu1 %v276_v4  ;;  %v124_v18 = vld [vmem:[%s347_s3] sm:$0x7]  ;;  %s212_s4 = sshll.u32 %s280_s29, 4  ;;  %s213_s4 = int_to_ptr.vmem [resolvable:$true] %s212_s4 }
   0x7   :  { %242 = vmatprep.subr.bf16.mxu1 %v277_v6  ;;  %239 = vmatprep.mubr.msk.f32.mxu1 %vm278_vm2, %v279_v7  ;;  %s252_s30 = scalar_lea.vmem %s213_s4, 64  ;;  %p257_p1 = scmp.lt.s32.totalorder %s213_s4, %s213_s4 }
   0x8   :  { %128 = vperm.xlu1 %251, %v125_v8   ;;  %p253_p0 = scmp.ne.s32.totalorder %s213_s4, %s252_s30  ;;  %p258_p2 = scmp.lt.s32.totalorder %s252_s30, %s252_s30 }
   0xa   :  { %33 = vperm.xlu0 %250, %v25_v5   ;;  %p259_p3 = por %p258_p2, %p257_p1 }
   0xc   :  { %p260_p4 = pnand %p259_p3, %p253_p0 }
  0x85   :  { %v29_v9 = vpop.permute.xlu0 %28 }
  0x87   :  { %v129_v19 = vpop.permute.xlu1 %128 }
  0x89   :  { %v34_v10 = vpop.permute.xlu0 %33 }
  0xd8   :  { %v234_v11 = vpop.f32.mrb[0].mxu0 }
  0xd9   :  { %v119_v12 = vadd.f32 %v234_v11, %v34_v10  ;;  %v113_v13 = vpop.f32.mrb[1].mxu0 }
  0xda   :  { %v114_v14 = vadd.f32 %v113_v13, %v29_v9 }
  0xdb   :  { %v123_v15 = vmax.f32 %v119_v12, 0.0 }
  0xdc   :  { %v122_v16 = vmax.f32 %v114_v14, 0.0 }
  0xde   :  { %v243_v17 = vpack.c.bf16 %v123_v15, %v122_v16 }
  0xe0   :  { %244 = vmatpush3.bf16.msra.mxu1 %v243_v17 }
  0xe3   :  { %240 = vmatmul.mubr.msk.f32.vlgmr.msra.gmra.mrb[0].mxu1 %vm131_vm3, %v124_v18 }
 0x1b6   :  { %v201_v20 = vpop.f32.mrb[0].mxu1 }
 0x1b7   :  { %v202_v21 = vadd.f32 %v201_v20, %v129_v19  ;;  %v241_v22 = vpop.f32.mrb[1].mxu1 }
 0x1b9   :  { %205 = vst [vmem:[#allocation2] sm:$0x7] %v202_v21 }
 0x1ba   :  { %263 = shalt.err (!%p260_p4)
}
 0x1bb   :  { %s264_s3 = scalar_lea.hbm %s349_s5, 64 }
 0x1bc   :  { %p265_p5 = scmp.ne.s32.totalorder %s349_s5, %s264_s3  ;;  %p268_p6 = scmp.lt.u32.totalorder %s264_s3, %s349_s5 }
 0x1be   :  { %p270_p7 = pnand %p268_p6, %p265_p5 }
 0x1c0   :  { %273 = shalt.err (!%p270_p7)
}
 0x1c1   :  { %215 = dma.vmem_to_hbm [thread:$0]  %s213_s4, 64, %s349_s5, [#allocation3]  }
 0x1c2   :  { %274 = dma.done.wait [#allocation3], 64  }
 0x1c3   :  { %275 = vsyncadd [#allocation3], 4294967232 }
 0x1c4   :  { %219 = vsyncpa [#allocation3], 1 }

</bundles_post_ra>
